<compile_context>
chip_gen: v6e
topology: v6e:2x2x1
jax: 0.10.0
libtpu: 0.0.40
codegen_flags: <defaults>
</compile_context>

<pallas_src>
import numpy as np

import jax
import jax.numpy as jnp
from jax.experimental import pallas as pl
from jax.experimental.pallas import tpu as pltpu


def docking_score_kernel(blk_idx_ref,    # SMEM [T*K]    int32 (prefetch; used only by index_maps)
                         blk_cnt_ref,    # SMEM [T]      int32 valid node-blocks per graph tile
                         batch_idx_ref,  # [1, N_TILE]   int32 graph id per node (-1 = pad)
                         node_emb_ref,   # [N_TILE, P]   bf16  encoder node embeddings
                         ligand_ref,     # [B_TILE, L]   f32   ligand features
                         w1_ref,         # [P + L, Hp]   f32   first-linear weights (whole)
                         b1_ref,         # [1, Hp]       f32
                         w2_row_ref,     # [1, Hp]       f32   second-linear weights as a row
                         b2_ref,         # [1, 1]        f32
                         out_ref,        # [B_TILE, 128] f32   lane-dense padded score slab
                         pooled_acc):    # [B_TILE, P]   f32   VMEM accumulator scratch
    i = pl.program_id(0)                 # graph-tile index (parallel)
    k = pl.program_id(1)                 # node-block step within this graph tile (reduction)

    b_tile, p_dim = pooled_acc.shape
    n_tile = node_emb_ref.shape[0]

    # ---- init accumulator on the first node step ----
    @pl.when(k == 0)
    def _init():
        pooled_acc[...] = jnp.zeros_like(pooled_acc)

    # ---- global_add_pool: tile-local one-hot segment matmul (MXU, bf16 ops, f32 acc) ----
    # Only for node blocks that actually belong to this graph tile (data-dependent count).
    @pl.when(k < blk_cnt_ref[i])
    def _accumulate():
        # Shift ids on the [1, N_TILE] row (cheap), compare against a plain iota.
        ids = batch_idx_ref[...] - i * b_tile                              # [1, N_TILE]
        row = jax.lax.broadcasted_iota(jnp.int32, (b_tile, n_tile), 0)     # [B_TILE, N_TILE]
        one_hot = (row == ids).astype(jnp.bfloat16)                        # exact in bf16
        pooled_acc[...] += jnp.dot(one_hot, node_emb_ref[...],
                                   preferred_element_type=jnp.float32)     # [B_TILE, P] f32

    # ---- finalize: regressor on the last node step (runs once per graph tile) ----
    @pl.when(k == pl.num_programs(1) - 1)
    def _finalize():
        l_dim = ligand_ref.shape[1]
        # cat([pooled, ligand]) @ W1 == pooled @ W1[:P] + ligand @ W1[P:]
        # (static Ref views of the whole W1; all f32 for accuracy — runs once per tile)
        w1p = w1_ref[pl.ds(0, p_dim), :]                                   # [P, Hp]
        w1l = w1_ref[pl.ds(p_dim, l_dim), :]                               # [L, Hp]
        h = (jnp.dot(pooled_acc[...], w1p, preferred_element_type=jnp.float32)
             + jnp.dot(ligand_ref[...], w1l, preferred_element_type=jnp.float32)
             + b1_ref[...])                                                # [B_TILE, Hp]

        # SiLU in f32 (v5e VPU/EUP has no bf16 path). Padded lanes: silu(0)=0.
        h = h * jax.nn.sigmoid(h)

        # Linear(Hp -> 1) as VPU multiply + lane reduction (padded lanes of w2 are 0).
        scores = jnp.sum(h * w2_row_ref[...], axis=-1, keepdims=True) + b2_ref[...]

        # Lane-dense padded output slab -> unmasked stores; wrapper reads column 0.
        out_ref[...] = jnp.broadcast_to(scores, out_ref.shape)


def _round_up(x, m):
    return ((x + m - 1) // m) * m


def docking_score_predict(batch_idx, node_emb, ligand_features, w1, b1, w2, b2):
    """batch_idx: [N] int32 (sorted, as torch_geometric produces), node_emb: [N, P],
    ligand_features: [B, L], w1: [P+L, H], b1: [H], w2: [H, 1], b2: [1]
    -> scores [B, 1] (float32).

    Note: batch_idx must be a concrete array (node-range offsets are computed
    host-side to size the data-dependent grid)."""
    N, P = node_emb.shape
    B, L = ligand_features.shape
    H = w1.shape[1]
    H_pad = _round_up(H, 128)
    OUT_LANES = 128

    # ---- device-generation-aware graph tiling ----
    try:
        kind = jax.devices()[0].device_kind.lower()
    except Exception:
        kind = ""
    b_cap = 128 if "v5" in kind else 256        # v5e MXU rows = 128; v6e/v7x = 256
    if B > 8:
        # keep >=2 graph tiles so v7x's 2nd TensorCore isn't idle on the parallel axis
        B_TILE = min(b_cap, _round_up(pl.cdiv(B, 2), 8))
    else:
        B_TILE = _round_up(max(B, 1), 8)
    B_pad = _round_up(B, B_TILE)
    num_graph_tiles = B_pad // B_TILE

    # ---- node tiling (reduction axis) ----
    N_TILE = min(2048, _round_up(max(N, 1), 128))
    N_pad = _round_up(N, N_TILE)
    total_node_blocks = N_pad // N_TILE

    # ---- per-graph-tile contiguous node-block ranges (batch_idx is sorted) ----
    bidx_np = np.asarray(jax.device_get(batch_idx)).astype(np.int64)
    tile_lo = np.arange(num_graph_tiles, dtype=np.int64) * B_TILE
    node_lo = np.searchsorted(bidx_np, tile_lo, side="left")
    node_hi = np.searchsorted(bidx_np, tile_lo + B_TILE, side="left")
    blk_lo = node_lo // N_TILE
    blk_hi = -(-node_hi // N_TILE)                               # ceil
    blk_cnt = np.where(node_hi > node_lo, blk_hi - blk_lo, 0).astype(np.int32)
    max_blocks = max(int(blk_cnt.max()) if blk_cnt.size else 0, 1)
    # Flat [T * max_blocks] block-index table, clamped so skipped steps DMA in-bounds.
    blk_idx = blk_lo[:, None] + np.arange(max_blocks, dtype=np.int64)[None, :]
    blk_idx = np.minimum(blk_idx, total_node_blocks - 1).astype(np.int32).reshape(-1)

    # ---- pad / cast inputs ----
    # Padded nodes get graph id -1 so they never pool anywhere (nodes with
    # batch_idx >= B are likewise dropped by the final [:B] slice, matching
    # segment_sum(num_segments=B)).
    batch_idx_p = jnp.full((1, N_pad), -1, dtype=jnp.int32)
    batch_idx_p = batch_idx_p.at[0, :N].set(batch_idx.astype(jnp.int32))
    node_emb_p = jnp.zeros((N_pad, P), jnp.bfloat16).at[:N, :].set(
        node_emb.astype(jnp.bfloat16))
    ligand_p = jnp.zeros((B_pad, L), jnp.float32).at[:B, :].set(
        ligand_features.astype(jnp.float32))

    # Zero-pad hidden dim to 128 lanes (padded lanes contribute 0 through SiLU*w2).
    w1_p = jnp.zeros((P + L, H_pad), jnp.float32).at[:, :H].set(w1.astype(jnp.float32))
    b1_p = jnp.zeros((1, H_pad), jnp.float32).at[0, :H].set(b1.astype(jnp.float32))
    w2_row_p = jnp.zeros((1, H_pad), jnp.float32).at[0, :H].set(
        w2.reshape(-1).astype(jnp.float32))
    b2_p = b2.reshape(1, 1).astype(jnp.float32)

    # Data-dependent node-block index maps via scalar prefetch (positional trailing args).
    nb = lambda i, k, bi, bc: (bi[i * max_blocks + k], 0)        # node_emb blocks
    bid = lambda i, k, bi, bc: (0, bi[i * max_blocks + k])       # batch_idx blocks

    out_slab = pl.pallas_call(
        docking_score_kernel,
        out_shape=jax.ShapeDtypeStruct((B_pad, OUT_LANES), jnp.float32),
        grid_spec=pltpu.PrefetchScalarGridSpec(
            num_scalar_prefetch=2,
            grid=(num_graph_tiles, max_blocks),
            in_specs=[
                pl.BlockSpec((1, N_TILE), bid),                          # batch ids
                pl.BlockSpec((N_TILE, P), nb),                           # node embeddings
                pl.BlockSpec((B_TILE, L), lambda i, k, bi, bc: (i, 0)),  # ligand features
                pl.BlockSpec((P + L, H_pad), lambda i, k, bi, bc: (0, 0)),  # w1 (whole)
                pl.BlockSpec((1, H_pad), lambda i, k, bi, bc: (0, 0)),   # b1
                pl.BlockSpec((1, H_pad), lambda i, k, bi, bc: (0, 0)),   # w2 row
                pl.BlockSpec((1, 1), lambda i, k, bi, bc: (0, 0)),       # b2
            ],
            out_specs=pl.BlockSpec((B_TILE, OUT_LANES), lambda i, k, bi, bc: (i, 0)),
            scratch_shapes=[pltpu.VMEM((B_TILE, P), jnp.float32)],       # pooled accumulator
        ),
        compiler_params=pltpu.CompilerParams(
            dimension_semantics=("parallel", "arbitrary"),
            vmem_limit_bytes=32 * 1024 * 1024,   # well under v7x's 64 MiB physical VMEM
        ),
    )(jnp.asarray(blk_idx, dtype=jnp.int32),
      jnp.asarray(blk_cnt, dtype=jnp.int32),
      batch_idx_p,
      node_emb_p,
      ligand_p,
      w1_p,
      b1_p,
      w2_row_p,
      b2_p)

    return out_slab[:B, 0:1]


def _reference(batch_idx, node_emb, ligand_features, w1, b1, w2, b2, num_graphs):
    pooled = jax.ops.segment_sum(node_emb, batch_idx, num_segments=num_graphs)
    x = jnp.concatenate([pooled, ligand_features], axis=1).astype(jnp.float32)
    h = x @ w1 + b1
    h = h * jax.nn.sigmoid(h)
    return h @ w2 + b2


if __name__ == "__main__":
    # Small shapes consistent with the module defaults.
    hidden_dim = 32
    pharmacophore_dim = 64
    ligand_features_dim = 300
    num_graphs = 4        # batch of pharmacophore graphs
    num_nodes = 24        # total nodes across the batch

    key = jax.random.PRNGKey(0)
    k1, k2, k3, k4, k5, k6, k7 = jax.random.split(key, 7)

    # "Encoder output" node embeddings + graph assignment (sorted, as torch_geometric does).
    node_emb = jax.random.normal(k1, (num_nodes, pharmacophore_dim), dtype=jnp.float32)
    batch_idx = jnp.sort(jax.random.randint(k2, (num_nodes,), 0, num_graphs)).astype(jnp.int32)
    ligand_features = jax.random.normal(k3, (num_graphs, ligand_features_dim), dtype=jnp.float32)

    # Deterministic regressor params (nn.Linear-style uniform init).
    fan_in1 = pharmacophore_dim + ligand_features_dim
    bound1 = 1.0 / (fan_in1 ** 0.5)
    w1 = jax.random.uniform(k4, (fan_in1, hidden_dim), minval=-bound1, maxval=bound1)
    b1 = jax.random.uniform(k5, (hidden_dim,), minval=-bound1, maxval=bound1)
    bound2 = 1.0 / (hidden_dim ** 0.5)
    w2 = jax.random.uniform(k6, (hidden_dim, 1), minval=-bound2, maxval=bound2)
    b2 = jax.random.uniform(k7, (1,), minval=-bound2, maxval=bound2)

    out = docking_score_predict(batch_idx, node_emb, ligand_features, w1, b1, w2, b2)
    out = jax.block_until_ready(out)

    ref = _reference(batch_idx, node_emb, ligand_features, w1, b1, w2, b2, num_graphs)
    assert out.shape == (num_graphs, 1)
    # Only node_emb is bf16 (pooling MXU pass); the regressor runs fully in f32.
    assert jnp.allclose(out, ref, atol=2e-2, rtol=2e-2), (out, ref)

    print("KERNEL_OK")
</pallas_src>

<mosaic_0001>
module attributes {stable_mosaic.version = 11 : i64} {
  func.func @docking_score_kernel(%arg0: i32, %arg1: i32, %arg2: memref<1xi32, #tpu.memory_space<smem>>, %arg3: memref<1xi32, #tpu.memory_space<smem>>, %arg4: memref<1x128xi32, #tpu.memory_space<vmem>>, %arg5: memref<128x64xbf16, #tpu.memory_space<vmem>>, %arg6: memref<8x300xf32, #tpu.memory_space<vmem>>, %arg7: memref<364x128xf32, #tpu.memory_space<vmem>>, %arg8: memref<1x128xf32, #tpu.memory_space<vmem>>, %arg9: memref<1x128xf32, #tpu.memory_space<vmem>>, %arg10: memref<1x1xf32, #tpu.memory_space<vmem>>, %arg11: memref<8x128xf32, #tpu.memory_space<vmem>>, %arg12: memref<8x64xf32, #tpu.memory_space<vmem>>) attributes {dimension_semantics = [#tpu.dimension_semantics<parallel>, #tpu.dimension_semantics<arbitrary>], iteration_bounds = array<i64: 1, 1>, scalar_prefetch = 2 : i64, scratch_operands = 1 : i64, tpu.core_type = #tpu.core_type<tc>, window_params = [{transform_indices = @transform_0, window_bounds = array<i64: 1, 128>}, {transform_indices = @transform_1, window_bounds = array<i64: 128, 64>}, {transform_indices = @transform_2, window_bounds = array<i64: 8, 300>}, {pipeline_mode = #tpu.pipeline_mode<synchronous>, transform_indices = @transform_3, window_bounds = array<i64: 364, 128>}, {pipeline_mode = #tpu.pipeline_mode<synchronous>, transform_indices = @transform_4, window_bounds = array<i64: 1, 128>}, {pipeline_mode = #tpu.pipeline_mode<synchronous>, transform_indices = @transform_5, window_bounds = array<i64: 1, 128>}, {pipeline_mode = #tpu.pipeline_mode<synchronous>, transform_indices = @transform_6, window_bounds = array<i64: 1, 1>}, {transform_indices = @transform_7, window_bounds = array<i64: 8, 128>}]} {
    %c0_i32 = arith.constant 0 : i32
    %0 = arith.cmpi eq, %arg1, %c0_i32 : i32
    %1 = arith.extui %0 : i1 to i32
    %c0_i32_0 = arith.constant 0 : i32
    %2 = arith.cmpi ne, %1, %c0_i32_0 : i32
    scf.if %2 {
      %cst = arith.constant 0.000000e+00 : f32
      %11 = vector.broadcast %cst : f32 to vector<8x64xf32>
      %c0 = arith.constant 0 : index
      %c0_4 = arith.constant 0 : index
      %12 = vector.load %arg12[%c0, %c0_4] : memref<8x64xf32, #tpu.memory_space<vmem>>, vector<8x64xf32>
      tpu.vector_store %arg12[%c0, %c0_4], %11 {strides = array<i32>} : memref<8x64xf32, #tpu.memory_space<vmem>>, vector<8x64xf32>,
    } else {
    }
    %3 = arith.index_cast %arg0 : i32 to index
    %4 = memref.load %arg3[%3] : memref<1xi32, #tpu.memory_space<smem>>
    %5 = arith.cmpi slt, %arg1, %4 : i32
    %6 = arith.extui %5 : i1 to i32
    %c0_i32_1 = arith.constant 0 : i32
    %7 = arith.cmpi ne, %6, %c0_i32_1 : i32
    scf.if %7 {
      %c0 = arith.constant 0 : index
      %c0_4 = arith.constant 0 : index
      %11 = vector.load %arg4[%c0, %c0_4] : memref<1x128xi32, #tpu.memory_space<vmem>>, vector<1x128xi32>
      %c8_i32 = arith.constant 8 : i32
      %12 = arith.muli %arg0, %c8_i32 : i32
      %13 = vector.broadcast %12 : i32 to vector<1x128xi32>
      %14 = arith.subi %11, %13 : vector<1x128xi32>
      %15 = tpu.iota {dimensions = array<i32: 0>} : vector<8x128xi32>
      %16 = vector.broadcast %14 : vector<1x128xi32> to vector<8x128xi32>
      %17 = arith.cmpi eq, %15, %16 : vector<8x128xi32>
      %18 = arith.extui %17 : vector<8x128xi1> to vector<8x128xi32>
      %19 = arith.sitofp %18 : vector<8x128xi32> to vector<8x128xf32>
      %20 = arith.truncf %19 : vector<8x128xf32> to vector<8x128xbf16>
      %c0_5 = arith.constant 0 : index
      %c0_6 = arith.constant 0 : index
      %21 = vector.load %arg12[%c0_5, %c0_6] : memref<8x64xf32, #tpu.memory_space<vmem>>, vector<8x64xf32>
      %c0_7 = arith.constant 0 : index
      %c0_8 = arith.constant 0 : index
      %22 = vector.load %arg5[%c0_7, %c0_8] : memref<128x64xbf16, #tpu.memory_space<vmem>>, vector<128x64xbf16>
      %cst = arith.constant dense<0.000000e+00> : vector<8x64xf32>
      %23 = tpu.matmul %20, %22, %cst {dimension_numbers = #tpu.dot_dimension_numbers<[1], [0], [0], [1], [0, 0, 1, 1], [], []>} : vector<8x128xbf16>, vector<128x64xbf16>, vector<8x64xf32> -> vector<8x64xf32>
      %24 = arith.addf %21, %23 : vector<8x64xf32>
      %c0_9 = arith.constant 0 : index
      %c0_10 = arith.constant 0 : index
      %25 = vector.load %arg12[%c0_9, %c0_10] : memref<8x64xf32, #tpu.memory_space<vmem>>, vector<8x64xf32>
      tpu.vector_store %arg12[%c0_9, %c0_10], %24 {strides = array<i32>} : memref<8x64xf32, #tpu.memory_space<vmem>>, vector<8x64xf32>,
    } else {
    }
    %c0_i32_2 = arith.constant 0 : i32
    %8 = arith.cmpi eq, %arg1, %c0_i32_2 : i32
    %9 = arith.extui %8 : i1 to i32
    %c0_i32_3 = arith.constant 0 : i32
    %10 = arith.cmpi ne, %9, %c0_i32_3 : i32
    scf.if %10 {
      %c0 = arith.constant 0 : index
      %c0_4 = arith.constant 0 : index
      %11 = vector.load %arg7[%c0, %c0_4] : memref<364x128xf32, #tpu.memory_space<vmem>>, vector<64x128xf32>
      %c64 = arith.constant 64 : index
      %c0_5 = arith.constant 0 : index
      %12 = vector.load %arg7[%c64, %c0_5] : memref<364x128xf32, #tpu.memory_space<vmem>>, vector<300x128xf32>
      %c0_6 = arith.constant 0 : index
      %c0_7 = arith.constant 0 : index
      %13 = vector.load %arg12[%c0_6, %c0_7] : memref<8x64xf32, #tpu.memory_space<vmem>>, vector<8x64xf32>
      %cst = arith.constant dense<0.000000e+00> : vector<8x128xf32>
      %14 = tpu.matmul %13, %11, %cst {dimension_numbers = #tpu.dot_dimension_numbers<[1], [0], [0], [1], [0, 0, 1, 1], [], []>} : vector<8x64xf32>, vector<64x128xf32>, vector<8x128xf32> -> vector<8x128xf32>
      %c0_8 = arith.constant 0 : index
      %c0_9 = arith.constant 0 : index
      %15 = vector.load %arg6[%c0_8, %c0_9] : memref<8x300xf32, #tpu.memory_space<vmem>>, vector<8x300xf32>
      %cst_10 = arith.constant dense<0.000000e+00> : vector<8x128xf32>
      %16 = tpu.matmul %15, %12, %cst_10 {dimension_numbers = #tpu.dot_dimension_numbers<[1], [0], [0], [1], [0, 0, 1, 1], [], []>} : vector<8x300xf32>, vector<300x128xf32>, vector<8x128xf32> -> vector<8x128xf32>
      %17 = arith.addf %14, %16 : vector<8x128xf32>
      %c0_11 = arith.constant 0 : index
      %c0_12 = arith.constant 0 : index
      %18 = vector.load %arg8[%c0_11, %c0_12] : memref<1x128xf32, #tpu.memory_space<vmem>>, vector<1x128xf32>
      %19 = vector.broadcast %18 : vector<1x128xf32> to vector<8x128xf32>
      %20 = arith.addf %17, %19 : vector<8x128xf32>
      %21 = arith.negf %20 : vector<8x128xf32>
      %22 = math.exp %21 : vector<8x128xf32>
      %cst_13 = arith.constant 1.000000e+00 : f32
      %23 = vector.broadcast %cst_13 : f32 to vector<8x128xf32>
      %24 = arith.addf %23, %22 : vector<8x128xf32>
      %25 = arith.divf %23, %24 : vector<8x128xf32>
      %26 = arith.mulf %20, %25 : vector<8x128xf32>
      %c0_14 = arith.constant 0 : index
      %c0_15 = arith.constant 0 : index
      %27 = vector.load %arg9[%c0_14, %c0_15] : memref<1x128xf32, #tpu.memory_space<vmem>>, vector<1x128xf32>
      %28 = vector.broadcast %27 : vector<1x128xf32> to vector<8x128xf32>
      %29 = arith.mulf %26, %28 : vector<8x128xf32>
      %cst_16 = arith.constant dense<0.000000e+00> : vector<8xf32>
      %30 = vector.multi_reduction <add>, %29, %cst_16 [1] : vector<8x128xf32> to vector<8xf32>
      %31 = vector.shape_cast %30 : vector<8xf32> to vector<8x1xf32>
      %c0_17 = arith.constant 0 : index
      %c0_18 = arith.constant 0 : index
      %32 = vector.load %arg10[%c0_17, %c0_18] : memref<1x1xf32, #tpu.memory_space<vmem>>, vector<1x1xf32>
      %33 = vector.broadcast %32 : vector<1x1xf32> to vector<8x1xf32>
      %34 = arith.addf %31, %33 : vector<8x1xf32>
      %35 = vector.shape_cast %34 : vector<8x1xf32> to vector<8x1xf32>
      %36 = vector.broadcast %35 : vector<8x1xf32> to vector<8x128xf32>
      %c0_19 = arith.constant 0 : index
      %c0_20 = arith.constant 0 : index
      %37 = vector.load %arg11[%c0_19, %c0_20] : memref<8x128xf32, #tpu.memory_space<vmem>>, vector<8x128xf32>
      tpu.vector_store %arg11[%c0_19, %c0_20], %36 {strides = array<i32>} : memref<8x128xf32, #tpu.memory_space<vmem>>, vector<8x128xf32>,
    } else {
    }
    return
  }
  func.func @transform_0(%arg0: i32, %arg1: i32, %arg2: memref<1xi32, #tpu.memory_space<smem>>, %arg3: memref<1xi32, #tpu.memory_space<smem>>) -> (i32, i32) {
    %c1_i32 = arith.constant 1 : i32
    %0 = arith.muli %arg0, %c1_i32 : i32
    %1 = arith.addi %0, %arg1 : i32
    %2 = arith.index_cast %1 : i32 to index
    %3 = memref.load %arg2[%2] : memref<1xi32, #tpu.memory_space<smem>>
    %c0_i32 = arith.constant 0 : i32
    %c0_i32_0 = arith.constant 0 : i32
    return %c0_i32, %3 : i32, i32
  }
  func.func @transform_1(%arg0: i32, %arg1: i32, %arg2: memref<1xi32, #tpu.memory_space<smem>>, %arg3: memref<1xi32, #tpu.memory_space<smem>>) -> (i32, i32) {
    %c1_i32 = arith.constant 1 : i32
    %0 = arith.muli %arg0, %c1_i32 : i32
    %1 = arith.addi %0, %arg1 : i32
    %2 = arith.index_cast %1 : i32 to index
    %3 = memref.load %arg2[%2] : memref<1xi32, #tpu.memory_space<smem>>
    %c0_i32 = arith.constant 0 : i32
    %c0_i32_0 = arith.constant 0 : i32
    return %3, %c0_i32 : i32, i32
  }
  func.func @transform_2(%arg0: i32, %arg1: i32, %arg2: memref<1xi32, #tpu.memory_space<smem>>, %arg3: memref<1xi32, #tpu.memory_space<smem>>) -> (i32, i32) {
    %c0_i32 = arith.constant 0 : i32
    %c0_i32_0 = arith.constant 0 : i32
    return %arg0, %c0_i32 : i32, i32
  }
  func.func @transform_3(%arg0: i32, %arg1: i32, %arg2: memref<1xi32, #tpu.memory_space<smem>>, %arg3: memref<1xi32, #tpu.memory_space<smem>>) -> (i32, i32) {
    %c0_i32 = arith.constant 0 : i32
    %c0_i32_0 = arith.constant 0 : i32
    %c0_i32_1 = arith.constant 0 : i32
    return %c0_i32, %c0_i32_0 : i32, i32
  }
  func.func @transform_4(%arg0: i32, %arg1: i32, %arg2: memref<1xi32, #tpu.memory_space<smem>>, %arg3: memref<1xi32, #tpu.memory_space<smem>>) -> (i32, i32) {
    %c0_i32 = arith.constant 0 : i32
    %c0_i32_0 = arith.constant 0 : i32
    %c0_i32_1 = arith.constant 0 : i32
    return %c0_i32, %c0_i32_0 : i32, i32
  }
  func.func @transform_5(%arg0: i32, %arg1: i32, %arg2: memref<1xi32, #tpu.memory_space<smem>>, %arg3: memref<1xi32, #tpu.memory_space<smem>>) -> (i32, i32) {
    %c0_i32 = arith.constant 0 : i32
    %c0_i32_0 = arith.constant 0 : i32
    %c0_i32_1 = arith.constant 0 : i32
    return %c0_i32, %c0_i32_0 : i32, i32
  }
  func.func @transform_6(%arg0: i32, %arg1: i32, %arg2: memref<1xi32, #tpu.memory_space<smem>>, %arg3: memref<1xi32, #tpu.memory_space<smem>>) -> (i32, i32) {
    %c0_i32 = arith.constant 0 : i32
    %c0_i32_0 = arith.constant 0 : i32
    %c0_i32_1 = arith.constant 0 : i32
    return %c0_i32, %c0_i32_0 : i32, i32
  }
  func.func @transform_7(%arg0: i32, %arg1: i32, %arg2: memref<1xi32, #tpu.memory_space<smem>>, %arg3: memref<1xi32, #tpu.memory_space<smem>>) -> (i32, i32) {
    %c0_i32 = arith.constant 0 : i32
    %c0_i32_0 = arith.constant 0 : i32
    return %arg0, %c0_i32 : i32, i32
  }
}

</mosaic_0001>

<bundles_post_ra>
// kernel: tpu_custom_call.1
= control target key start
LH: loop header
LB: loop body
LE: loop exit
PB: predicated region body
PF: predicated region fallthrough
CT: control target
= control target key end

     0   :  { %s896_s0 = inlined_call_operand.<no memory space> [shape: s32[1], index: 0, kind: input, shape index: {}]   ;;  %s897_s1 = inlined_call_operand.<no memory space> [shape: s32[1], index: 1, kind: input, shape index: {}]   ;;  %s898_s2 = inlined_call_operand.vmem [shape: s32[1,128], index: 2, kind: input, shape index: {}]   ;;  %s899_s3 = inlined_call_operand.vmem [shape: bf16[128,64], index: 3, kind: input, shape index: {}]   ;;  %s900_s4 = inlined_call_operand.vmem [shape: f32[8,300], index: 4, kind: input, shape index: {}]   ;;  %s901_s5 = inlined_call_operand.hbm [shape: f32[364,128], index: 5, kind: input, shape index: {}]   ;;  %s902_s6 = inlined_call_operand.vmem [shape: f32[1,128], index: 6, kind: input, shape index: {}]   ;;  %s903_s7 = inlined_call_operand.vmem [shape: f32[1,128], index: 7, kind: input, shape index: {}]   ;;  %s904_s8 = inlined_call_operand.<no memory space> [shape: f32[1,1], index: 8, kind: input, shape index: {}]   ;;  %s905_s9 = inlined_call_operand.hbm [shape: f32[8,128], index: 9, kind: output, shape index: {}]  }
   0x1   :  { %v16_v0 = vstv %s904_s8 }
   0x2   :  { %17 = vst [vmem:[#allocation6] sm:$0x1] %v16_v0 }
   0x3   :  { %18 = vsyncpa [#allocation8], 0 }
   0x4   :  { %19 = vsyncpa [#allocation9], 0  ;;  %s769_s11 = smov [#allocation7]  }
   0x5   :  { %s48_s12 = sshll.u32 %s769_s11, 4  ;;  %s49_s12 = int_to_ptr.vmem [resolvable:$true] %s48_s12 }
   0x6   :  { %s733_s13 = scalar_lea.vmem %s49_s12, 5888  ;;  %p738_p1 = scmp.lt.s32.totalorder %s49_s12, %s49_s12 }
   0x7   :  { %p734_p0 = scmp.ne.s32.totalorder %s49_s12, %s733_s13  ;;  %p739_p2 = scmp.lt.s32.totalorder %s733_s13, %s733_s13 }
   0x9   :  { %p740_p3 = por %p739_p2, %p738_p1 }
   0xb   :  { %p741_p4 = pnand %p740_p3, %p734_p0 }
   0xd   :  { %744 = shalt.err (!%p741_p4)
}
   0xe   :  { %s770_s14 = smov 128   ;;  %s771_s15 = smov 8  }
   0xf   :  { %54 = dma.hbm_to_vmem [thread:$0]  %s901_s5, 5888, %s49_s12, [#allocation8], %s770_s14, %s770_s14, %s771_s15  }
  0x10   :  { %765 = dma.done.wait [#allocation8], 5888  }
  0x11   :  { %766 = vsyncadd [#allocation8], 4294961408  ;;  %p78_p5 = scmp.lt.s32.totalorder %s896_s0, 0  ;;  %s565_s21 = sshll.u32 %s896_s0, 4  ;;  %vm98_vm0 = vcmask 523264   ;;  %v772_v1 = vmov 0.0  }
  0x12   :  { %p86_p6 = scmp.lt.s32.totalorder %s565_s21, 15  ;;  %99 = vst.msk [vmem:[#allocation2] sm:$0xff] %vm98_vm0, %v772_v1  ;;  %p568_p7 = scmp.le.s32.totalorder %s897_s1, 0 }
  0x13   :  { %s907_s0 = smov (!%p78_p5, %s896_s0), 0 }
  0x14   :  { %s909_s21 = smov (!%p86_p6, %s565_s21), 15  ;;  %s80_s25 = scalar_lea.vmem %s898_s2, %s907_s0 }
  0x15   :  { %s566_s26 = sshll.u32 %s909_s21, 2  ;;  %104 = sbr.rel (%p568_p7) target bundleno = 258 (0x102), region = 41 }
  0x16   :  { %s89_s29 = scalar_lea.vmem %s899_s3, %s566_s26 }
  0x1a   :  { %v712_v2 = vld [vmem:[%s89_s29 + $0x38] sm:$0xff]   ;;  %v773_v3 = vmov 0.0   ;;  %v713_v4 = vld [vmem:[%s89_s29 + $0x30] sm:$0xff]   ;;  %vm774_vm1 = vmmov 0   ;;  %v714_v5 = vld [vmem:[%s89_s29 + $0x28] sm:$0xff]   ;;  %v109_v9 = vlaneseq }
  0x1b   :  { %648 = vmatprep.subr.bf16.mxu0 %v773_v3  ;;  %664 = vmatprep.mubr.msk.bf16.mxu0 %vm774_vm1, %v773_v3  ;;  %v715_v6 = vld [vmem:[%s89_s29 + $0x20] sm:$0xff]   ;;  %v716_v7 = vld [vmem:[%s89_s29 + $0x18] sm:$0xff]   ;;  %v717_v8 = vld [vmem:[%s89_s29 + $0x10] sm:$0xff]   ;;  %v775_v14 = vmov 1.0|1.0  }
  0x1c   :  { %649 = vmatpush3.bf16.msra.mxu0 %v712_v2  ;;  %v718_v10 = vld [vmem:[%s89_s29 + $0x8] sm:$0xff]   ;;  %v110_v11 = vshrl.u32 %v109_v9, 7  ;;  %v569_v12 = vld [vmem:[%s80_s25] ss:$0 sm:$0xff] }
  0x1d   :  { %650 = vmatprep.subr.bf16.mxu0 %v773_v3  ;;  %v719_v13 = vld [vmem:[%s89_s29] sm:$0xff]  }
  0x1e   :  { %vm115_vm2 = vcmp.eq.s32.totalorder %v110_v11, %v569_v12  ;;  %v119_v15 = vld [vmem:[#allocation2] sm:$0xff] }
  0x1f   :  { %vm579_vm3 = vmpackc.low %vm115_vm2, %vm115_vm2 }
  0x20   :  { %651 = vmatpush3.bf16.msra.mxu0 %v713_v4 }
  0x21   :  { %652 = vmatprep.subr.bf16.mxu0 %v773_v3 }
  0x24   :  { %653 = vmatpush3.bf16.msra.mxu0 %v714_v5 }
  0x25   :  { %654 = vmatprep.subr.bf16.mxu0 %v773_v3 }
  0x28   :  { %655 = vmatpush3.bf16.msra.mxu0 %v715_v6 }
  0x29   :  { %656 = vmatprep.subr.bf16.mxu0 %v773_v3 }
  0x2c   :  { %657 = vmatpush3.bf16.msra.mxu0 %v716_v7 }
  0x2d   :  { %658 = vmatprep.subr.bf16.mxu0 %v773_v3 }
  0x30   :  { %659 = vmatpush3.bf16.msra.mxu0 %v717_v8 }
  0x31   :  { %660 = vmatprep.subr.bf16.mxu0 %v773_v3 }
  0x34   :  { %661 = vmatpush3.bf16.msra.mxu0 %v718_v10 }
  0x35   :  { %662 = vmatprep.subr.bf16.mxu0 %v773_v3 }
  0x38   :  { %663 = vmatpush3.bf16.msra.mxu0 %v719_v13 }
  0x3b   :  { %665 = vmatmul.mubr.msk.bf16.vlgmr.msra.gmra.mxu0 %vm579_vm3, %v775_v14 }
  0xfb   :  { %v218_v16 = vpop.f32.mrf.mxu0 }
  0xfc   :  { %v224_v17 = vadd.f32 %v218_v16, %v119_v15 }
  0xfd   :  { %v666_v18 = vpop.f32.mrf.mxu0 }
  0xfe   :  { %226 = vst.msk [vmem:[#allocation2] sm:$0xff] %vm98_vm0, %v224_v17 }
  0xff   :  { %v221_v19 = vpop.f32.mrf.mxu0 }
 0x101   :  { %v667_v20 = vpop.f32.mrf.mxu0 }
 0x102 PF:  { %v269_v21 = vld [vmem:[#allocation7 + $0x138] sm:$0xff]  ;;  %v268_v23 = vld [vmem:[#allocation7 + $0x130] sm:$0xff]  ;;  %668 = vmatprep.subr.mxu1 %v772_v1  ;;  %vm284_vm4 = vcmask 1043456   ;;  %vm776_vm5 = vmmov 0   ;;  %v267_v25 = vld [vmem:[#allocation7 + $0x128] sm:$0xff]  ;;  %vm280_vm6 = vcmask 359424  }
 0x103   :  { %v253_v22 = vld [vmem:[#allocation7 + $0xb8] sm:$0xff]  ;;  %597 = vmatprep.subr.mxu0 %v269_v21  ;;  %v252_v24 = vld [vmem:[#allocation7 + $0xb0] sm:$0xff]  ;;  %680 = vmatprep.mubr.msk.f32.mxu1 %vm776_vm5, %v772_v1  ;;  %v251_v26 = vld [vmem:[#allocation7 + $0xa8] sm:$0xff] }
 0x104   :  { %598 = vmatpush3.msra.mxu0 %v253_v22  ;;  %v275_v27 = vld [vmem:[#allocation7 + $0x168] sm:$0xf]  ;;  %v266_v28 = vld [vmem:[#allocation7 + $0x120] sm:$0xff]  ;;  %v273_v31 = vld [vmem:[#allocation7 + $0x158] sm:$0xff] }
 0x105   :  { %599 = vmatprep.subr.mxu0 %v268_v23  ;;  %669 = vmatpush3.msk.msra.mxu1 %vm284_vm4, %v275_v27  ;;  %v274_v29 = vld [vmem:[#allocation7 + $0x160] sm:$0xff]  ;;  %v265_v32 = vld [vmem:[#allocation7 + $0x118] sm:$0xff]  ;;  %v272_v34 = vld [vmem:[#allocation7 + $0x150] sm:$0xff] }
 0x106   :  { %600 = vmatpush3.msra.mxu0 %v252_v24  ;;  %v250_v30 = vld [vmem:[#allocation7 + $0xa0] sm:$0xff]  ;;  %670 = vmatprep.subr.mxu1 %v772_v1  ;;  %v249_v33 = vld [vmem:[#allocation7 + $0x98] sm:$0xff]  ;;  %v264_v35 = vld [vmem:[#allocation7 + $0x110] sm:$0xff] }
 0x107   :  { %601 = vmatprep.subr.mxu0 %v267_v25  ;;  %671 = vmatpush3.msra.mxu1 %v274_v29  ;;  %v248_v36 = vld [vmem:[#allocation7 + $0x90] sm:$0xff]  ;;  %v271_v37 = vld [vmem:[#allocation7 + $0x148] sm:$0xff]  ;;  %v270_v40 = vld [vmem:[#allocation7 + $0x140] sm:$0xff]  ;;  %v777_v25 = vmov 0  }
 0x108   :  { %602 = vmatpush3.msra.mxu0 %v251_v26  ;;  %672 = vmatprep.subr.mxu1 %v772_v1  ;;  %v263_v38 = vld [vmem:[#allocation7 + $0x108] sm:$0xff]  ;;  %v262_v41 = vld [vmem:[#allocation7 + $0x100] sm:$0xff]  ;;  %v261_v44 = vld [vmem:[#allocation7 + $0xf8] sm:$0xff] }
 0x109   :  { %603 = vmatprep.subr.mxu0 %v266_v28  ;;  %673 = vmatpush3.msra.mxu1 %v273_v31  ;;  %v247_v39 = vld [vmem:[#allocation7 + $0x88] sm:$0xff]  ;;  %v246_v42 = vld [vmem:[#allocation7 + $0x80] sm:$0xff]  ;;  %v237_v45 = vld [vmem:[#allocation7 + $0x38] sm:$0xff] }
 0x10a   :  { %604 = vmatpush3.msra.mxu0 %v250_v30  ;;  %674 = vmatprep.subr.mxu1 %v772_v1  ;;  %v279_v43 = vld [vmem:[%s900_s4 + $0x10] sm:$0xff]  ;;  %v245_v46 = vld [vmem:[#allocation7 + $0x78] sm:$0xff]  ;;  %v260_v47 = vld [vmem:[#allocation7 + $0xf0] sm:$0xff] }
 0x10b   :  { %605 = vmatprep.subr.mxu0 %v265_v32  ;;  %675 = vmatpush3.msra.mxu1 %v272_v34  ;;  %v236_v48 = vld [vmem:[#allocation7 + $0x30] sm:$0xff]  ;;  %v259_v50 = vld [vmem:[#allocation7 + $0xe8] sm:$0xff]  ;;  %v258_v53 = vld [vmem:[#allocation7 + $0xe0] sm:$0xff] }
 0x10c   :  { %606 = vmatpush3.msra.mxu0 %v249_v33  ;;  %676 = vmatprep.subr.mxu1 %v772_v1  ;;  %v244_v49 = vld [vmem:[#allocation7 + $0x70] sm:$0xff]  ;;  %v235_v51 = vld [vmem:[#allocation7 + $0x28] sm:$0xff]  ;;  %v234_v54 = vld [vmem:[#allocation7 + $0x20] sm:$0xff] }
 0x10d   :  { %607 = vmatprep.subr.mxu0 %v264_v35  ;;  %677 = vmatpush3.msra.mxu1 %v271_v37  ;;  %v243_v52 = vld [vmem:[#allocation7 + $0x68] sm:$0xff]  ;;  %v242_v55 = vld [vmem:[#allocation7 + $0x60] sm:$0xff]  ;;  %v257_v56 = vld [vmem:[#allocation7 + $0xd8] sm:$0xff] }
 0x10e   :  { %608 = vmatpush3.msra.mxu0 %v248_v36  ;;  %678 = vmatprep.subr.mxu1 %v772_v1  ;;  %v233_v57 = vld [vmem:[#allocation7 + $0x18] sm:$0xff]  ;;  %v256_v59 = vld [vmem:[#allocation7 + $0xd0] sm:$0xff]  ;;  %v255_v63 = vld [vmem:[#allocation7 + $0xc8] sm:$0xff] }
 0x10f   :  { %609 = vmatprep.subr.mxu0 %v263_v38  ;;  %679 = vmatpush3.msra.mxu1 %v270_v40  ;;  %v241_v58 = vld [vmem:[#allocation7 + $0x58] sm:$0xff]  ;;  %v240_v61 = vld [vmem:[#allocation7 + $0x50] sm:$0xff]  ;;  %v239_v0 = vld [vmem:[#allocation7 + $0x48] sm:$0xff] }
 0x110   :  { %610 = vmatpush3.msra.mxu0 %v247_v39  ;;  %683 = vmatprep.subr.mxu1 %v772_v1  ;;  %v278_v60 = vld [vmem:[%s900_s4 + $0x8] sm:$0xff]  ;;  %v232_v62 = vld [vmem:[#allocation7 + $0x10] sm:$0xff]  ;;  %v231_v2 = vld [vmem:[#allocation7 + $0x8] sm:$0xff] }
 0x111   :  { %611 = vmatprep.subr.mxu0 %v262_v41  ;;  %681 = vmatmul.mubr.msk.f32.vlgmr.msra.gmra.mxu1 %vm280_vm6, %v279_v43  ;;  %v254_v3 = vld [vmem:[#allocation7 + $0xc0] sm:$0xff]  ;;  %v277_v6 = vld [vmem:[%s900_s4] sm:$0xff]  ;;  %v587_v26 = vld [vmem:[#allocation6] ss:$0 sm:$0xff] }
 0x112   :  { %612 = vmatpush3.msra.mxu0 %v246_v42  ;;  %684 = vmatpush3.msra.mxu1 %v237_v45  ;;  %v238_v4 = vld [vmem:[#allocation7 + $0x40] sm:$0xff]  ;;  %v276_v7 = vld [vmem:[#allocation2] sm:$0xff] }
 0x113   :  { %613 = vmatprep.subr.mxu0 %v261_v44  ;;  %685 = vmatprep.subr.mxu1 %v772_v1  ;;  %v230_v5 = vld [vmem:[#allocation7] sm:$0xff]  ;;  %v584_v16 = vld [vmem:[%s902_s6] ss:$0 sm:$0xff]  ;;  %s778_s6 = smov [#allocation10]  }
 0x114   :  { %614 = vmatpush3.msra.mxu0 %v245_v46  ;;  %686 = vmatpush3.msra.mxu1 %v236_v48  ;;  %v586_v22 = vld [vmem:[%s903_s7] ss:$0 sm:$0xff]  ;;  %s547_s16 = sshll.u32 %s778_s6, 4  ;;  %s548_s16 = int_to_ptr.vmem [resolvable:$true] %s547_s16 }
 0x115   :  { %615 = vmatprep.subr.mxu0 %v260_v47  ;;  %687 = vmatprep.subr.mxu1 %v772_v1  ;;  %s745_s17 = scalar_lea.vmem %s548_s16, 128  ;;  %p750_p9 = scmp.lt.s32.totalorder %s548_s16, %s548_s16 }
 0x116   :  { %616 = vmatpush3.msra.mxu0 %v244_v49  ;;  %688 = vmatpush3.msra.mxu1 %v235_v51  ;;  %p746_p8 = scmp.ne.s32.totalorder %s548_s16, %s745_s17  ;;  %p751_p10 = scmp.lt.s32.totalorder %s745_s17, %s745_s17 }
 0x117   :  { %617 = vmatprep.subr.mxu0 %v259_v50  ;;  %689 = vmatprep.subr.mxu1 %v772_v1 }
 0x118   :  { %618 = vmatpush3.msra.mxu0 %v243_v52  ;;  %690 = vmatpush3.msra.mxu1 %v234_v54  ;;  %p752_p11 = por %p751_p10, %p750_p9 }
 0x119   :  { %619 = vmatprep.subr.mxu0 %v258_v53  ;;  %691 = vmatprep.subr.mxu1 %v772_v1 }
 0x11a   :  { %620 = vmatpush3.msra.mxu0 %v242_v55  ;;  %692 = vmatpush3.msra.mxu1 %v233_v57  ;;  %p753_p12 = pnand %p752_p11, %p746_p8 }
 0x11b   :  { %621 = vmatprep.subr.mxu0 %v257_v56  ;;  %693 = vmatprep.subr.mxu1 %v772_v1 }
 0x11c   :  { %622 = vmatpush3.msra.mxu0 %v241_v58  ;;  %352 = vmatprep.mubr.f32.mxu0 %v278_v60 }
 0x11d   :  { %623 = vmatprep.subr.mxu0 %v256_v59  ;;  %694 = vmatpush3.msra.mxu1 %v232_v62 }
 0x11e   :  { %624 = vmatpush3.msra.mxu0 %v240_v61  ;;  %695 = vmatprep.subr.mxu1 %v772_v1 }
 0x11f   :  { %625 = vmatprep.subr.mxu0 %v255_v63  ;;  %696 = vmatpush3.msra.mxu1 %v231_v2 }
 0x120   :  { %626 = vmatpush3.msra.mxu0 %v239_v0  ;;  %697 = vmatprep.subr.mxu1 %v772_v1 }
 0x121   :  { %627 = vmatprep.subr.mxu0 %v254_v3  ;;  %698 = vmatpush3.msra.mxu1 %v230_v5 }
 0x122   :  { %628 = vmatpush3.msra.mxu0 %v238_v4  ;;  %699 = vmatprep.mubr.msk.f32.mxu1 %vm776_vm5, %v772_v1 }
 0x123   :  { %353 = vmatmul.mubr.f32.vlgmr.msra.gmra.mxu0 %v277_v6  ;;  %700 = vmatmul.mubr.msk.f32.vlgmr.msra.gmra.mxu1 %vm98_vm0, %v276_v7 }
 0x124   :  { %720 = vset.pattern.permute.xlu0 %v777_v25 }
 0x1d1   :  { %v424_v8 = vpop.f32.mrf.mxu1 }
 0x1d3   :  { %v682_v9 = vpop.f32.mrf.mxu1 }
 0x1e3   :  { %v629_v10 = vpop.f32.mrf.mxu0  ;;  %v498_v11 = vpop.f32.mrf.mxu1 }
 0x1e5   :  { %v630_v12 = vpop.f32.mrf.mxu0  ;;  %v701_v14 = vpop.f32.mrf.mxu1 }
 0x1e6   :  { %v631_v13 = vadd.f32 %v630_v12, %v629_v10 }
 0x1e8   :  { %v425_v15 = vadd.f32 %v631_v13, %v424_v8 }
 0x1ea   :  { %v499_v17 = vadd.f32 %v498_v11, %v425_v15 }
 0x1ec   :  { %v509_v18 = vadd.f32 %v584_v16, %v499_v17 }
 0x1ee   :  { %v585_v19 = vmul.f32 -1.442695, %v509_v18 }
 0x1f0   :  { %721 = vpow2.f32 %v585_v19 }
 0x1fd   :  { %v722_v20 = vpop.eup %721 }
 0x1fe   :  { %v513_v1 = vadd.f32 1.0, %v722_v20 }
 0x200   :  { %723 = vrcp.f32 %v513_v1 }
 0x20d   :  { %v724_v21 = vpop.eup %723 }
 0x20e   :  { %v516_v23 = vmul.f32 %v724_v21, %v509_v18 }
 0x210   :  { %v524_v24 = vmul.f32 %v586_v22, %v516_v23 }
 0x212   :  { %525 = vadd.xlane.f32.xlu0 %v524_v24 }
 0x29b   :  { %v526_v27 = vpop.xlane.xlu0 %525 }
 0x29c   :  { %v534_v28 = vadd.f32 %v587_v26, %v526_v27 }
 0x29e   :  { %537 = vperm.xlu0 %720, %v534_v28  }
 0x319   :  { %v538_v29 = vpop.permute.xlu0 %537 }
 0x31a   :  { %540 = vst [vmem:[#allocation10] sm:$0xff] %v538_v29 }
 0x31b   :  { %756 = shalt.err (!%p753_p12)
}
 0x31c   :  { %550 = dma.vmem_to_hbm [thread:$0]  %s548_s16, 128, %s905_s9, [#allocation9]  }
 0x31d   :  { %767 = dma.done.wait [#allocation9], 128  }
 0x31e   :  { %768 = vsyncadd [#allocation9], 4294967168 }
 0x31f   :  { %554 = vsyncpa [#allocation8], 1 }
 0x320   :  { %555 = vsyncpa [#allocation9], 1 }

</bundles_post_ra>
